<compile_context>
chip_gen: v6e
topology: v6e:2x2x1
jax: 0.10.0
libtpu: 0.0.40
codegen_flags: <defaults>
</compile_context>

<pallas_src>
import functools

import jax
import jax.numpy as jnp
from jax import lax
from jax.experimental import pallas as pl
from jax.experimental.pallas import tpu as pltpu


def _band_matmul(xp, w_ref, H, fused):
    """sum_k dot(xp[:, k:k+H, :], w_ref[k*L:(k+1)*L, :]) as one (or three) MXU matmuls.

    xp    : (Nb, H+2, L) halo-padded slab, compute dtype
    w_ref : (3*L, Ncols) stacked band weights
    returns (Nb*H, Ncols) float32
    """
    Nb, Hp, L = xp.shape
    M = Nb * H
    taps = [xp[:, k:k + H, :] for k in range(3)]       # static slices of the halo'd slab
    if fused:
        # Single matmul, K = 3*L: per-tap accumulation happens inside the MXU.
        lhs = jnp.concatenate(taps, axis=2).reshape(M, 3 * L)
        return jnp.dot(lhs, w_ref[...], preferred_element_type=jnp.float32)
    # Lane width not 128-aligned: keep per-tap dots (avoids unaligned lane concats).
    acc = jnp.dot(taps[0].reshape(M, L), w_ref[0 * L:1 * L, :],
                  preferred_element_type=jnp.float32)
    acc = acc + jnp.dot(taps[1].reshape(M, L), w_ref[1 * L:2 * L, :],
                        preferred_element_type=jnp.float32)
    acc = acc + jnp.dot(taps[2].reshape(M, L), w_ref[2 * L:3 * L, :],
                        preferred_element_type=jnp.float32)
    return acc


def _resconv_kernel(x_ref, w1_ref, b1sc_ref, w2_ref, b2_ref, o_ref, *, fuse1, fuse2):
    """Fused ResConvBlock on a lane-dense slab.

    x_ref    : (Nb, H+2, W*Cin)      input with a 1-row zero halo in H
    w1_ref   : (3*W*Cin, 2*W*Cout)   [stacked conv1 bands | 1x1 shortcut (center band)]
    b1sc_ref : (1, 2*W*Cout)         [conv1 bias | shortcut bias], f32
    w2_ref   : (3*W*Cout, W*Cout)    stacked conv2 bands
    b2_ref   : (1, W*Cout)           conv2 bias, f32
    o_ref    : (Nb, H, W*Cout)
    """
    Nb, Hp, WCin = x_ref.shape
    H = Hp - 2
    WCout = o_ref.shape[2]
    cdt = x_ref.dtype

    xp = x_ref[...]                                               # (Nb, H+2, W*Cin)

    # conv1 (3x3) and the 1x1 shortcut share one matmul (shortcut fused along N).
    y1 = _band_matmul(xp, w1_ref, H, fuse1) + b1sc_ref[...]       # (M, 2*W*Cout) f32
    h1 = jnp.maximum(y1[:, :WCout], 0.0)                          # ReLU(conv1 + b1)
    sc = y1[:, WCout:]                                            # shortcut (no ReLU)

    # conv2 (3x3) + ReLU: one zero-row halo for h1, then one fused band matmul.
    zrow = jnp.zeros((Nb, 1, WCout), cdt)
    h1p = jnp.concatenate([zrow, h1.astype(cdt).reshape(Nb, H, WCout), zrow], axis=1)
    h2 = jnp.maximum(_band_matmul(h1p, w2_ref, H, fuse2) + b2_ref[...], 0.0)

    # residual add + final ReLU, lane-dense store
    o_ref[...] = jnp.maximum(h2 + sc, 0.0).reshape(Nb, H, WCout).astype(o_ref.dtype)


def _banded_3x3(w_hwio, W):
    """(3, 3, Cin, Cout) HWIO weights -> (3, W*Cin, W*Cout) band matrices (one per kh).

    wb[kh, w_in*Cin + c, w_out*Cout + o] = w[kh, w_in - w_out + 1, c, o] if |w_in-w_out|<=1
    which folds the horizontal taps and the SAME padding in W into the matmul weights.
    """
    _, _, Cin, Cout = w_hwio.shape
    shifts = jnp.stack(
        [jnp.eye(W, k=1 - kx, dtype=w_hwio.dtype) for kx in range(3)])     # (3, W, W)
    wb = jnp.einsum('xab,yxco->yacbo', shifts, w_hwio)                      # (3,W,Cin,W,Cout)
    return wb.reshape(3, W * Cin, W * Cout)


def _blockdiag_1x1(ws, W):
    """(Cin, Cout) 1x1 weights -> (W*Cin, W*Cout) block-diagonal matrix."""
    Cin, Cout = ws.shape
    wd = jnp.einsum('ab,co->acbo', jnp.eye(W, dtype=ws.dtype), ws)
    return wd.reshape(W * Cin, W * Cout)


@functools.partial(jax.jit, static_argnames=("block_batch", "compute_dtype", "out_dtype"))
def res_conv_block(x_nchw, w1, b1, w2, b2, ws, bs,
                   block_batch=None, compute_dtype=jnp.bfloat16, out_dtype=jnp.float32):
    """NCHW in, NCHW out.  w1/w2 in HWIO; ws is (Cin, Cout) for the 1x1 shortcut."""
    N, Cin, H, W = x_nchw.shape
    Cout = b1.shape[0]
    WCin, WCout = W * Cin, W * Cout
    f32 = jnp.float32

    # ---- pack weights / biases (tiny, outside the kernel) ----
    w1b = _banded_3x3(w1.astype(f32), W).reshape(3 * WCin, WCout)
    scd = _blockdiag_1x1(ws.astype(f32), W)                         # (W*Cin, W*Cout)
    sc_col = jnp.concatenate(
        [jnp.zeros_like(scd), scd, jnp.zeros_like(scd)], axis=0)    # shortcut = center band
    w1e = jnp.concatenate([w1b, sc_col], axis=1).astype(compute_dtype)   # (3*WCin, 2*WCout)
    w2s = _banded_3x3(w2.astype(f32), W).reshape(3 * WCout, WCout).astype(compute_dtype)
    b1sc = jnp.concatenate([jnp.tile(b1.astype(f32), W),
                            jnp.tile(bs.astype(f32), W)]).reshape(1, 2 * WCout)
    b2t = jnp.tile(b2.astype(f32), W).reshape(1, WCout)

    # ---- lane-dense activations: NCHW -> (N, H, W*Cin) ----
    x = jnp.transpose(x_nchw, (0, 2, 3, 1)).reshape(N, H, WCin)

    # ---- batch blocking: target M = Nb*H ~ 256 MXU rows, but keep >= 2 parallel
    #      blocks whenever N > 1 so both v7x TensorCores get work ----
    if block_batch is None:
        Nb = max(1, min(N, max(1, 256 // H)))
        if N > 1 and pl.cdiv(N, Nb) < 2:
            Nb = pl.cdiv(N, 2)
    else:
        Nb = max(1, min(block_batch, N))
    nblk = pl.cdiv(N, Nb)
    Npad = nblk * Nb
    # Pad batch to a multiple of Nb and add the 1-row zero halo in H.
    x = jnp.pad(x, ((0, Npad - N), (1, 1), (0, 0))).astype(compute_dtype)

    fuse1 = (WCin % 128 == 0)
    fuse2 = (WCout % 128 == 0)
    kernel = functools.partial(_resconv_kernel, fuse1=fuse1, fuse2=fuse2)

    # ---- VMEM budget guard: banded weights are O((W*C)^2); clamp to v7x's 64 MiB ----
    csz = jnp.dtype(compute_dtype).itemsize
    osz = jnp.dtype(out_dtype).itemsize
    est = (2 * Nb * (H + 2) * WCin * csz            # double-buffered input blocks
           + 2 * Nb * H * WCout * osz               # double-buffered output blocks
           + 2 * (w1e.size + w2s.size) * csz        # weight blocks
           + 2 * (b1sc.size + b2t.size) * 4
           + 10 * Nb * H * WCout * 4)               # in-kernel f32 / lhs temporaries
    vmem_limit = int(min(64 * 2**20, max(32 * 2**20, 2 * est)))

    # NOTE: the weight/bias inputs are grid-invariant; single-buffering them
    # (pipeline_mode=pl.Buffered(1)) would save one VMEM copy each, but is left out to
    # stay on well-trodden compilation paths (they are tiny at these channel counts).
    out = pl.pallas_call(
        kernel,
        out_shape=jax.ShapeDtypeStruct((Npad, H, WCout), out_dtype),
        grid=(nblk,),
        in_specs=[
            pl.BlockSpec((Nb, H + 2, WCin), lambda b: (b, 0, 0)),
            pl.BlockSpec((3 * WCin, 2 * WCout), lambda b: (0, 0)),
            pl.BlockSpec((1, 2 * WCout), lambda b: (0, 0)),
            pl.BlockSpec((3 * WCout, WCout), lambda b: (0, 0)),
            pl.BlockSpec((1, WCout), lambda b: (0, 0)),
        ],
        out_specs=pl.BlockSpec((Nb, H, WCout), lambda b: (b, 0, 0)),
        compiler_params=pltpu.CompilerParams(
            dimension_semantics=("parallel",),
            vmem_limit_bytes=vmem_limit),
    )(x, w1e, b1sc, w2s, b2t)

    out = out[:N].reshape(N, H, W, Cout)
    return jnp.transpose(out, (0, 3, 1, 2))          # back to NCHW


def _reference(x_nchw, w1, b1, w2, b2, ws, bs):
    """Pure-JAX reference (lax convolutions), NCHW in/out."""
    x = jnp.transpose(x_nchw, (0, 2, 3, 1)).astype(jnp.float32)  # NHWC
    dn3_1 = lax.conv_dimension_numbers(x.shape, w1.shape, ("NHWC", "HWIO", "NHWC"))
    sc_w = ws[None, None]  # (1,1,Cin,Cout)
    dn1 = lax.conv_dimension_numbers(x.shape, sc_w.shape, ("NHWC", "HWIO", "NHWC"))

    shortcut = lax.conv_general_dilated(x, sc_w, (1, 1), "VALID",
                                        dimension_numbers=dn1) + bs
    h1 = lax.conv_general_dilated(x, w1, (1, 1), "SAME",
                                  dimension_numbers=dn3_1) + b1
    h1 = jnp.maximum(h1, 0.0)
    dn3_2 = lax.conv_dimension_numbers(h1.shape, w2.shape, ("NHWC", "HWIO", "NHWC"))
    h2 = lax.conv_general_dilated(h1, w2, (1, 1), "SAME",
                                  dimension_numbers=dn3_2) + b2
    h2 = jnp.maximum(h2, 0.0)
    out = jnp.maximum(h2 + shortcut, 0.0)
    return jnp.transpose(out, (0, 3, 1, 2))


if __name__ == "__main__":
    # ResConvBlock(in_channels=4, out_channels=8) on a 2x4x16x16 input.
    N, Cin, H, W = 2, 4, 16, 16
    Cout = 8

    key = jax.random.PRNGKey(0)
    kx, k1, kb1, k2, kb2, ks, kbs = jax.random.split(key, 7)

    x = jax.random.normal(kx, (N, Cin, H, W), jnp.float32)
    w1 = jax.random.normal(k1, (3, 3, Cin, Cout), jnp.float32) * 0.1   # conv1 weight (HWIO)
    b1 = jax.random.normal(kb1, (Cout,), jnp.float32) * 0.1
    w2 = jax.random.normal(k2, (3, 3, Cout, Cout), jnp.float32) * 0.1  # conv2 weight (HWIO)
    b2 = jax.random.normal(kb2, (Cout,), jnp.float32) * 0.1
    ws = jax.random.normal(ks, (Cin, Cout), jnp.float32) * 0.1         # 1x1 shortcut weight
    bs = jax.random.normal(kbs, (Cout,), jnp.float32) * 0.1

    ref = jax.block_until_ready(_reference(x, w1, b1, w2, b2, ws, bs))

    # Default path: bf16 MXU operands, f32 accumulation (v6e/v7x native rate).
    out_bf16 = jax.block_until_ready(res_conv_block(x, w1, b1, w2, b2, ws, bs))
    assert out_bf16.shape == (N, Cout, H, W)
    assert jnp.allclose(out_bf16, ref, atol=5e-2, rtol=5e-2), "bf16 path mismatch vs reference"

    # f32 path, tight tolerance.
    out_f32 = jax.block_until_ready(
        res_conv_block(x, w1, b1, w2, b2, ws, bs, compute_dtype=jnp.float32))
    assert out_f32.shape == (N, Cout, H, W)
    assert jnp.allclose(out_f32, ref, atol=1e-4, rtol=1e-4), "f32 path mismatch vs reference"

    print("KERNEL_OK")
</pallas_src>

<mosaic_0001>
module attributes {stable_mosaic.version = 11 : i64} {
  func.func @_resconv_kernel(%arg0: i32, %arg1: memref<1x18x64xbf16, #tpu.memory_space<vmem>>, %arg2: memref<192x256xbf16, #tpu.memory_space<vmem>>, %arg3: memref<1x256xf32, #tpu.memory_space<vmem>>, %arg4: memref<384x128xbf16, #tpu.memory_space<vmem>>, %arg5: memref<1x128xf32, #tpu.memory_space<vmem>>, %arg6: memref<1x16x128xf32, #tpu.memory_space<vmem>>) attributes {dimension_semantics = [#tpu.dimension_semantics<parallel>], iteration_bounds = array<i64: 2>, scalar_prefetch = 0 : i64, scratch_operands = 0 : i64, tpu.core_type = #tpu.core_type<tc>, window_params = [{transform_indices = @transform_0, window_bounds = array<i64: 1, 18, 64>}, {pipeline_mode = #tpu.pipeline_mode<synchronous>, transform_indices = @transform_1, window_bounds = array<i64: 192, 256>}, {pipeline_mode = #tpu.pipeline_mode<synchronous>, transform_indices = @transform_2, window_bounds = array<i64: 1, 256>}, {pipeline_mode = #tpu.pipeline_mode<synchronous>, transform_indices = @transform_3, window_bounds = array<i64: 384, 128>}, {pipeline_mode = #tpu.pipeline_mode<synchronous>, transform_indices = @transform_4, window_bounds = array<i64: 1, 128>}, {transform_indices = @transform_5, window_bounds = array<i64: 1, 16, 128>}]} {
    %c0 = arith.constant 0 : index
    %c0_0 = arith.constant 0 : index
    %c0_1 = arith.constant 0 : index
    %0 = vector.load %arg1[%c0, %c0_0, %c0_1] : memref<1x18x64xbf16, #tpu.memory_space<vmem>>, vector<1x18x64xbf16>
    %1 = vector.extract_strided_slice %0 {offsets = [0, 0, 0], sizes = [1, 16, 64], strides = [1, 1, 1]} : vector<1x18x64xbf16> to vector<1x16x64xbf16>
    %2 = vector.extract_strided_slice %0 {offsets = [0, 1, 0], sizes = [1, 16, 64], strides = [1, 1, 1]} : vector<1x18x64xbf16> to vector<1x16x64xbf16>
    %3 = vector.extract_strided_slice %0 {offsets = [0, 2, 0], sizes = [1, 16, 64], strides = [1, 1, 1]} : vector<1x18x64xbf16> to vector<1x16x64xbf16>
    %4 = vector.shape_cast %1 : vector<1x16x64xbf16> to vector<16x64xbf16>
    %c0_2 = arith.constant 0 : index
    %c0_3 = arith.constant 0 : index
    %5 = vector.load %arg2[%c0_2, %c0_3] : memref<192x256xbf16, #tpu.memory_space<vmem>>, vector<64x256xbf16>
    %cst = arith.constant dense<0.000000e+00> : vector<16x256xf32>
    %6 = tpu.matmul %4, %5, %cst {dimension_numbers = #tpu.dot_dimension_numbers<[1], [0], [0], [1], [0, 0, 1, 1], [], []>} : vector<16x64xbf16>, vector<64x256xbf16>, vector<16x256xf32> -> vector<16x256xf32>
    %7 = vector.shape_cast %2 : vector<1x16x64xbf16> to vector<16x64xbf16>
    %c64 = arith.constant 64 : index
    %c0_4 = arith.constant 0 : index
    %8 = vector.load %arg2[%c64, %c0_4] : memref<192x256xbf16, #tpu.memory_space<vmem>>, vector<64x256xbf16>
    %cst_5 = arith.constant dense<0.000000e+00> : vector<16x256xf32>
    %9 = tpu.matmul %7, %8, %cst_5 {dimension_numbers = #tpu.dot_dimension_numbers<[1], [0], [0], [1], [0, 0, 1, 1], [], []>} : vector<16x64xbf16>, vector<64x256xbf16>, vector<16x256xf32> -> vector<16x256xf32>
    %10 = arith.addf %6, %9 : vector<16x256xf32>
    %11 = vector.shape_cast %3 : vector<1x16x64xbf16> to vector<16x64xbf16>
    %c128 = arith.constant 128 : index
    %c0_6 = arith.constant 0 : index
    %12 = vector.load %arg2[%c128, %c0_6] : memref<192x256xbf16, #tpu.memory_space<vmem>>, vector<64x256xbf16>
    %cst_7 = arith.constant dense<0.000000e+00> : vector<16x256xf32>
    %13 = tpu.matmul %11, %12, %cst_7 {dimension_numbers = #tpu.dot_dimension_numbers<[1], [0], [0], [1], [0, 0, 1, 1], [], []>} : vector<16x64xbf16>, vector<64x256xbf16>, vector<16x256xf32> -> vector<16x256xf32>
    %14 = arith.addf %10, %13 : vector<16x256xf32>
    %c0_8 = arith.constant 0 : index
    %c0_9 = arith.constant 0 : index
    %15 = vector.load %arg3[%c0_8, %c0_9] : memref<1x256xf32, #tpu.memory_space<vmem>>, vector<1x256xf32>
    %16 = vector.broadcast %15 : vector<1x256xf32> to vector<16x256xf32>
    %17 = arith.addf %14, %16 : vector<16x256xf32>
    %18 = vector.extract_strided_slice %17 {offsets = [0, 0], sizes = [16, 128], strides = [1, 1]} : vector<16x256xf32> to vector<16x128xf32>
    %cst_10 = arith.constant 0.000000e+00 : f32
    %19 = vector.broadcast %cst_10 : f32 to vector<16x128xf32>
    %20 = arith.maximumf %18, %19 : vector<16x128xf32>
    %21 = vector.extract_strided_slice %17 {offsets = [0, 128], sizes = [16, 128], strides = [1, 1]} : vector<16x256xf32> to vector<16x128xf32>
    %cst_11 = arith.constant 0.000000e+00 : bf16
    %22 = vector.broadcast %cst_11 : bf16 to vector<1x1x128xbf16>
    %23 = arith.truncf %20 : vector<16x128xf32> to vector<16x128xbf16>
    %24 = vector.shape_cast %23 : vector<16x128xbf16> to vector<1x16x128xbf16>
    %25 = tpu.concatenate %22, %24, %22 in 1 : vector<1x1x128xbf16>, vector<1x16x128xbf16>, vector<1x1x128xbf16> -> vector<1x18x128xbf16>
    %26 = vector.extract_strided_slice %25 {offsets = [0, 0, 0], sizes = [1, 16, 128], strides = [1, 1, 1]} : vector<1x18x128xbf16> to vector<1x16x128xbf16>
    %27 = vector.extract_strided_slice %25 {offsets = [0, 1, 0], sizes = [1, 16, 128], strides = [1, 1, 1]} : vector<1x18x128xbf16> to vector<1x16x128xbf16>
    %28 = vector.extract_strided_slice %25 {offsets = [0, 2, 0], sizes = [1, 16, 128], strides = [1, 1, 1]} : vector<1x18x128xbf16> to vector<1x16x128xbf16>
    %29 = tpu.concatenate %26, %27, %28 in 2 : vector<1x16x128xbf16>, vector<1x16x128xbf16>, vector<1x16x128xbf16> -> vector<1x16x384xbf16>
    %30 = vector.shape_cast %29 : vector<1x16x384xbf16> to vector<16x384xbf16>
    %c0_12 = arith.constant 0 : index
    %c0_13 = arith.constant 0 : index
    %31 = vector.load %arg4[%c0_12, %c0_13] : memref<384x128xbf16, #tpu.memory_space<vmem>>, vector<384x128xbf16>
    %cst_14 = arith.constant dense<0.000000e+00> : vector<16x128xf32>
    %32 = tpu.matmul %30, %31, %cst_14 {dimension_numbers = #tpu.dot_dimension_numbers<[1], [0], [0], [1], [0, 0, 1, 1], [], []>} : vector<16x384xbf16>, vector<384x128xbf16>, vector<16x128xf32> -> vector<16x128xf32>
    %c0_15 = arith.constant 0 : index
    %c0_16 = arith.constant 0 : index
    %33 = vector.load %arg5[%c0_15, %c0_16] : memref<1x128xf32, #tpu.memory_space<vmem>>, vector<1x128xf32>
    %34 = vector.broadcast %33 : vector<1x128xf32> to vector<16x128xf32>
    %35 = arith.addf %32, %34 : vector<16x128xf32>
    %cst_17 = arith.constant 0.000000e+00 : f32
    %36 = vector.broadcast %cst_17 : f32 to vector<16x128xf32>
    %37 = arith.maximumf %35, %36 : vector<16x128xf32>
    %38 = arith.addf %37, %21 : vector<16x128xf32>
    %cst_18 = arith.constant 0.000000e+00 : f32
    %39 = vector.broadcast %cst_18 : f32 to vector<16x128xf32>
    %40 = arith.maximumf %38, %39 : vector<16x128xf32>
    %41 = vector.shape_cast %40 : vector<16x128xf32> to vector<1x16x128xf32>
    %c0_19 = arith.constant 0 : index
    %c0_20 = arith.constant 0 : index
    %c0_21 = arith.constant 0 : index
    %42 = vector.load %arg6[%c0_19, %c0_20, %c0_21] : memref<1x16x128xf32, #tpu.memory_space<vmem>>, vector<1x16x128xf32>
    tpu.vector_store %arg6[%c0_19, %c0_20, %c0_21], %41 {strides = array<i32>} : memref<1x16x128xf32, #tpu.memory_space<vmem>>, vector<1x16x128xf32>,
    return
  }
  func.func @transform_0(%arg0: i32) -> (i32, i32, i32) {
    %c0_i32 = arith.constant 0 : i32
    %c0_i32_0 = arith.constant 0 : i32
    %c0_i32_1 = arith.constant 0 : i32
    return %arg0, %c0_i32, %c0_i32_0 : i32, i32, i32
  }
  func.func @transform_1(%arg0: i32) -> (i32, i32) {
    %c0_i32 = arith.constant 0 : i32
    %c0_i32_0 = arith.constant 0 : i32
    %c0_i32_1 = arith.constant 0 : i32
    return %c0_i32, %c0_i32_0 : i32, i32
  }
  func.func @transform_2(%arg0: i32) -> (i32, i32) {
    %c0_i32 = arith.constant 0 : i32
    %c0_i32_0 = arith.constant 0 : i32
    %c0_i32_1 = arith.constant 0 : i32
    return %c0_i32, %c0_i32_0 : i32, i32
  }
  func.func @transform_3(%arg0: i32) -> (i32, i32) {
    %c0_i32 = arith.constant 0 : i32
    %c0_i32_0 = arith.constant 0 : i32
    %c0_i32_1 = arith.constant 0 : i32
    return %c0_i32, %c0_i32_0 : i32, i32
  }
  func.func @transform_4(%arg0: i32) -> (i32, i32) {
    %c0_i32 = arith.constant 0 : i32
    %c0_i32_0 = arith.constant 0 : i32
    %c0_i32_1 = arith.constant 0 : i32
    return %c0_i32, %c0_i32_0 : i32, i32
  }
  func.func @transform_5(%arg0: i32) -> (i32, i32, i32) {
    %c0_i32 = arith.constant 0 : i32
    %c0_i32_0 = arith.constant 0 : i32
    %c0_i32_1 = arith.constant 0 : i32
    return %arg0, %c0_i32, %c0_i32_0 : i32, i32, i32
  }
}

</mosaic_0001>

<bundles_post_ra>
// kernel: tile.18
= control target key start
LH: loop header
LB: loop body
LE: loop exit
PB: predicated region body
PF: predicated region fallthrough
CT: control target
= control target key end

     0   :  { %s28_s0 = inlined_call_operand.vmem [shape: f32[8], index: 0, kind: input, shape index: {}]   ;;  %s29_s1 = inlined_call_operand.vmem [shape: f32[16,8], index: 1, kind: output, shape index: {}]  }
   0x1   :  { %v4_v0 = vld [vmem:[%s28_s0] ss:$0 sm:$0xff] }
   0x2   :  { %5 = vst [vmem:[%s29_s1] sm:$0xff] %v4_v0  ;;  %8 = vst [vmem:[%s29_s1 + $0x8] sm:$0xff] %v4_v0 }

// kernel: tile.19
= control target key start
LH: loop header
LB: loop body
LE: loop exit
PB: predicated region body
PF: predicated region fallthrough
CT: control target
= control target key end

     0   :  { %s133_s10 = smov 120   ;;  %s134_s11 = smov 104   ;;  %vm3_vm0 = vcmask 64512   ;;  %vm9_vm1 = vcmask 1048512   ;;  %vm15_vm2 = vcmask 982912   ;;  %vm21_vm3 = vcmask 917312   ;;  %s209_s0 = inlined_call_operand.vmem [shape: f32[16,8], index: 0, kind: input, shape index: {}]   ;;  %s210_s1 = inlined_call_operand.vmem [shape: f32[128], index: 1, kind: output, shape index: {}]  }
   0x1   :  { %v103_v0 = vld [vmem:[%s209_s0 + $0xf] sm:$0x1]   ;;  %v105_v1 = vld [vmem:[%s209_s0 + $0xd] sm:$0x1]   ;;  %v104_v2 = vld [vmem:[%s209_s0 + $0xe] sm:$0x1]  }
   0x2   :  { %7 = vrot.lane.b32.xlu0 %v103_v0, %s133_s10  ;;  %19 = vrot.lane.b32.xlu1 %v105_v1, %s134_s11  ;;  %v106_v3 = vld [vmem:[%s209_s0 + $0xc] sm:$0x1]   ;;  %s135_s16 = smov 112   ;;  %s136_s17 = smov 96   ;;  %v107_v4 = vld [vmem:[%s209_s0 + $0xb] sm:$0x1]  }
   0x3   :  { %v108_v5 = vld [vmem:[%s209_s0 + $0xa] sm:$0x1]   ;;  %v2_v6 = vld [vmem:[%s209_s0] sm:$0x1]   ;;  %s137_s24 = smov 88   ;;  %s138_s25 = smov 80  }
   0x4   :  { %4 = vst.msk [vmem:[#allocation0] sm:$0x1] %vm3_vm0, %v2_v6   ;;  %v109_v7 = vld [vmem:[%s209_s0 + $0x9] sm:$0x1]   ;;  %v110_v8 = vld [vmem:[%s209_s0 + $0x8] sm:$0x1]  }
   0x5   :  { %s139_s30 = smov 72   ;;  %s140_s2 = smov 64   ;;  %v111_v9 = vld [vmem:[%s209_s0 + $0x7] sm:$0x1]   ;;  %v112_v10 = vld [vmem:[%s209_s0 + $0x6] sm:$0x1]  }
   0x6   :  { %13 = vrot.lane.b32.xlu0 %v104_v2, %s135_s16  ;;  %25 = vrot.lane.b32.xlu1 %v106_v3, %s136_s17  ;;  %s141_s7 = smov 56   ;;  %s142_s8 = smov 48   ;;  %v113_v11 = vld [vmem:[%s209_s0 + $0x5] sm:$0x1]   ;;  %v114_v12 = vld [vmem:[%s209_s0 + $0x4] sm:$0x1]  }
   0x7   :  { %s143_s13 = smov 40   ;;  %s144_s14 = smov 32   ;;  %v115_v13 = vld [vmem:[%s209_s0 + $0x3] sm:$0x1]   ;;  %v116_v14 = vld [vmem:[%s209_s0 + $0x2] sm:$0x1]  }
   0x8   :  { %s145_s19 = smov 24   ;;  %s146_s20 = smov 16   ;;  %v117_v15 = vld [vmem:[%s209_s0 + $0x1] sm:$0x1]   ;;  %vm27_vm4 = vcmask 851712   ;;  %vm33_vm5 = vcmask 786112  }
   0x9   :  { %s147_s0 = smov 8   ;;  %vm39_vm6 = vcmask 720512   ;;  %vm45_vm7 = vcmask 654912   ;;  %vm51_vm8 = vcmask 589312   ;;  %vm57_vm9 = vcmask 523712  }
   0xa   :  { %31 = vrot.lane.b32.xlu0 %v107_v4, %s137_s24  ;;  %37 = vrot.lane.b32.xlu1 %v108_v5, %s138_s25  ;;  %vm63_vm10 = vcmask 458112   ;;  %vm69_vm11 = vcmask 392512   ;;  %vm75_vm12 = vcmask 326912   ;;  %vm81_vm13 = vcmask 261312  }
   0xb   :  { %vm87_vm14 = vcmask 195712   ;;  %vm93_vm15 = vcmask 130112  }
   0xe   :  { %43 = vrot.lane.b32.xlu0 %v109_v7, %s139_s30  ;;  %49 = vrot.lane.b32.xlu1 %v110_v8, %s140_s2 }
  0x12   :  { %55 = vrot.lane.b32.xlu0 %v111_v9, %s141_s7  ;;  %61 = vrot.lane.b32.xlu1 %v112_v10, %s142_s8 }
  0x16   :  { %67 = vrot.lane.b32.xlu0 %v113_v11, %s143_s13  ;;  %73 = vrot.lane.b32.xlu1 %v114_v12, %s144_s14 }
  0x1a   :  { %79 = vrot.lane.b32.xlu0 %v115_v13, %s145_s19  ;;  %85 = vrot.lane.b32.xlu1 %v116_v14, %s146_s20 }
  0x1e   :  { %91 = vrot.lane.b32.xlu0 %v117_v15, %s147_s0 }
  0x74   :  { %v8_v16 = vpop.permute.xlu0 %7   ;;  %v20_v17 = vpop.permute.xlu1 %19  }
  0x75   :  { %10 = vst.msk [vmem:[#allocation0] sm:$0x1] %vm9_vm1, %v8_v16  }
  0x78   :  { %v14_v18 = vpop.permute.xlu0 %13   ;;  %v26_v19 = vpop.permute.xlu1 %25  }
  0x79   :  { %16 = vst.msk [vmem:[#allocation0] sm:$0x1] %vm15_vm2, %v14_v18  }
  0x7a   :  { %22 = vst.msk [vmem:[#allocation0] sm:$0x1] %vm21_vm3, %v20_v17  }
  0x7b   :  { %28 = vst.msk [vmem:[#allocation0] sm:$0x1] %vm27_vm4, %v26_v19  }
  0x7c   :  { %v32_v20 = vpop.permute.xlu0 %31   ;;  %v38_v21 = vpop.permute.xlu1 %37  }
  0x7d   :  { %34 = vst.msk [vmem:[#allocation0] sm:$0x1] %vm33_vm5, %v32_v20  }
  0x7e   :  { %40 = vst.msk [vmem:[#allocation0] sm:$0x1] %vm39_vm6, %v38_v21  }
  0x80   :  { %v44_v22 = vpop.permute.xlu0 %43   ;;  %v50_v23 = vpop.permute.xlu1 %49  }
  0x81   :  { %46 = vst.msk [vmem:[#allocation0] sm:$0x1] %vm45_vm7, %v44_v22  }
  0x82   :  { %52 = vst.msk [vmem:[#allocation0] sm:$0x1] %vm51_vm8, %v50_v23  }
  0x84   :  { %v56_v24 = vpop.permute.xlu0 %55   ;;  %v62_v25 = vpop.permute.xlu1 %61  }
  0x85   :  { %58 = vst.msk [vmem:[#allocation0] sm:$0x1] %vm57_vm9, %v56_v24  }
  0x86   :  { %64 = vst.msk [vmem:[#allocation0] sm:$0x1] %vm63_vm10, %v62_v25  }
  0x88   :  { %v68_v26 = vpop.permute.xlu0 %67   ;;  %v74_v27 = vpop.permute.xlu1 %73  }
  0x89   :  { %70 = vst.msk [vmem:[#allocation0] sm:$0x1] %vm69_vm11, %v68_v26  }
  0x8a   :  { %76 = vst.msk [vmem:[#allocation0] sm:$0x1] %vm75_vm12, %v74_v27  }
  0x8c   :  { %v80_v28 = vpop.permute.xlu0 %79   ;;  %v86_v29 = vpop.permute.xlu1 %85  }
  0x8d   :  { %82 = vst.msk [vmem:[#allocation0] sm:$0x1] %vm81_vm13, %v80_v28  }
  0x8e   :  { %88 = vst.msk [vmem:[#allocation0] sm:$0x1] %vm87_vm14, %v86_v29  }
  0x90   :  { %v92_v30 = vpop.permute.xlu0 %91  }
  0x91   :  { %94 = vst.msk [vmem:[#allocation0] sm:$0x1] %vm93_vm15, %v92_v30  }
  0x98   :  { %v99_v31 = vld [vmem:[#allocation0] sm:$0x1] }
  0x99   :  { %102 = vst [vmem:[%s210_s1] sm:$0x1] %v99_v31 }

// kernel: tile.29
= control target key start
LH: loop header
LB: loop body
LE: loop exit
PB: predicated region body
PF: predicated region fallthrough
CT: control target
= control target key end

     0   :  { %s133_s10 = smov 120   ;;  %s134_s11 = smov 104   ;;  %vm3_vm0 = vcmask 64512   ;;  %vm9_vm1 = vcmask 1048512   ;;  %vm15_vm2 = vcmask 982912   ;;  %vm21_vm3 = vcmask 917312   ;;  %s209_s0 = inlined_call_operand.vmem [shape: f32[16,8], index: 0, kind: input, shape index: {}]   ;;  %s210_s1 = inlined_call_operand.vmem [shape: f32[1,128], index: 1, kind: output, shape index: {}]  }
   0x1   :  { %v103_v0 = vld [vmem:[%s209_s0 + $0xf] sm:$0x1]   ;;  %v105_v1 = vld [vmem:[%s209_s0 + $0xd] sm:$0x1]   ;;  %v104_v2 = vld [vmem:[%s209_s0 + $0xe] sm:$0x1]  }
   0x2   :  { %7 = vrot.lane.b32.xlu0 %v103_v0, %s133_s10  ;;  %19 = vrot.lane.b32.xlu1 %v105_v1, %s134_s11  ;;  %v106_v3 = vld [vmem:[%s209_s0 + $0xc] sm:$0x1]   ;;  %s135_s16 = smov 112   ;;  %s136_s17 = smov 96   ;;  %v107_v4 = vld [vmem:[%s209_s0 + $0xb] sm:$0x1]  }
   0x3   :  { %v108_v5 = vld [vmem:[%s209_s0 + $0xa] sm:$0x1]   ;;  %v2_v6 = vld [vmem:[%s209_s0] sm:$0x1]   ;;  %s137_s24 = smov 88   ;;  %s138_s25 = smov 80  }
   0x4   :  { %4 = vst.msk [vmem:[#allocation0] sm:$0x1] %vm3_vm0, %v2_v6   ;;  %v109_v7 = vld [vmem:[%s209_s0 + $0x9] sm:$0x1]   ;;  %v110_v8 = vld [vmem:[%s209_s0 + $0x8] sm:$0x1]  }
   0x5   :  { %s139_s30 = smov 72   ;;  %s140_s2 = smov 64   ;;  %v111_v9 = vld [vmem:[%s209_s0 + $0x7] sm:$0x1]   ;;  %v112_v10 = vld [vmem:[%s209_s0 + $0x6] sm:$0x1]  }
   0x6   :  { %13 = vrot.lane.b32.xlu0 %v104_v2, %s135_s16  ;;  %25 = vrot.lane.b32.xlu1 %v106_v3, %s136_s17  ;;  %s141_s7 = smov 56   ;;  %s142_s8 = smov 48   ;;  %v113_v11 = vld [vmem:[%s209_s0 + $0x5] sm:$0x1]   ;;  %v114_v12 = vld [vmem:[%s209_s0 + $0x4] sm:$0x1]  }
   0x7   :  { %s143_s13 = smov 40   ;;  %s144_s14 = smov 32   ;;  %v115_v13 = vld [vmem:[%s209_s0 + $0x3] sm:$0x1]   ;;  %v116_v14 = vld [vmem:[%s209_s0 + $0x2] sm:$0x1]  }
   0x8   :  { %s145_s19 = smov 24   ;;  %s146_s20 = smov 16   ;;  %v117_v15 = vld [vmem:[%s209_s0 + $0x1] sm:$0x1]   ;;  %vm27_vm4 = vcmask 851712   ;;  %vm33_vm5 = vcmask 786112  }
   0x9   :  { %s147_s0 = smov 8   ;;  %vm39_vm6 = vcmask 720512   ;;  %vm45_vm7 = vcmask 654912   ;;  %vm51_vm8 = vcmask 589312   ;;  %vm57_vm9 = vcmask 523712  }
   0xa   :  { %31 = vrot.lane.b32.xlu0 %v107_v4, %s137_s24  ;;  %37 = vrot.lane.b32.xlu1 %v108_v5, %s138_s25  ;;  %vm63_vm10 = vcmask 458112   ;;  %vm69_vm11 = vcmask 392512   ;;  %vm75_vm12 = vcmask 326912   ;;  %vm81_vm13 = vcmask 261312  }
   0xb   :  { %vm87_vm14 = vcmask 195712   ;;  %vm93_vm15 = vcmask 130112  }
   0xe   :  { %43 = vrot.lane.b32.xlu0 %v109_v7, %s139_s30  ;;  %49 = vrot.lane.b32.xlu1 %v110_v8, %s140_s2 }
  0x12   :  { %55 = vrot.lane.b32.xlu0 %v111_v9, %s141_s7  ;;  %61 = vrot.lane.b32.xlu1 %v112_v10, %s142_s8 }
  0x16   :  { %67 = vrot.lane.b32.xlu0 %v113_v11, %s143_s13  ;;  %73 = vrot.lane.b32.xlu1 %v114_v12, %s144_s14 }
  0x1a   :  { %79 = vrot.lane.b32.xlu0 %v115_v13, %s145_s19  ;;  %85 = vrot.lane.b32.xlu1 %v116_v14, %s146_s20 }
  0x1e   :  { %91 = vrot.lane.b32.xlu0 %v117_v15, %s147_s0 }
  0x74   :  { %v8_v16 = vpop.permute.xlu0 %7   ;;  %v20_v17 = vpop.permute.xlu1 %19  }
  0x75   :  { %10 = vst.msk [vmem:[#allocation0] sm:$0x1] %vm9_vm1, %v8_v16  }
  0x78   :  { %v14_v18 = vpop.permute.xlu0 %13   ;;  %v26_v19 = vpop.permute.xlu1 %25  }
  0x79   :  { %16 = vst.msk [vmem:[#allocation0] sm:$0x1] %vm15_vm2, %v14_v18  }
  0x7a   :  { %22 = vst.msk [vmem:[#allocation0] sm:$0x1] %vm21_vm3, %v20_v17  }
  0x7b   :  { %28 = vst.msk [vmem:[#allocation0] sm:$0x1] %vm27_vm4, %v26_v19  }
  0x7c   :  { %v32_v20 = vpop.permute.xlu0 %31   ;;  %v38_v21 = vpop.permute.xlu1 %37  }
  0x7d   :  { %34 = vst.msk [vmem:[#allocation0] sm:$0x1] %vm33_vm5, %v32_v20  }
  0x7e   :  { %40 = vst.msk [vmem:[#allocation0] sm:$0x1] %vm39_vm6, %v38_v21  }
  0x80   :  { %v44_v22 = vpop.permute.xlu0 %43   ;;  %v50_v23 = vpop.permute.xlu1 %49  }
  0x81   :  { %46 = vst.msk [vmem:[#allocation0] sm:$0x1] %vm45_vm7, %v44_v22  }
  0x82   :  { %52 = vst.msk [vmem:[#allocation0] sm:$0x1] %vm51_vm8, %v50_v23  }
  0x84   :  { %v56_v24 = vpop.permute.xlu0 %55   ;;  %v62_v25 = vpop.permute.xlu1 %61  }
  0x85   :  { %58 = vst.msk [vmem:[#allocation0] sm:$0x1] %vm57_vm9, %v56_v24  }
  0x86   :  { %64 = vst.msk [vmem:[#allocation0] sm:$0x1] %vm63_vm10, %v62_v25  }
  0x88   :  { %v68_v26 = vpop.permute.xlu0 %67   ;;  %v74_v27 = vpop.permute.xlu1 %73  }
  0x89   :  { %70 = vst.msk [vmem:[#allocation0] sm:$0x1] %vm69_vm11, %v68_v26  }
  0x8a   :  { %76 = vst.msk [vmem:[#allocation0] sm:$0x1] %vm75_vm12, %v74_v27  }
  0x8c   :  { %v80_v28 = vpop.permute.xlu0 %79   ;;  %v86_v29 = vpop.permute.xlu1 %85  }
  0x8d   :  { %82 = vst.msk [vmem:[#allocation0] sm:$0x1] %vm81_vm13, %v80_v28  }
  0x8e   :  { %88 = vst.msk [vmem:[#allocation0] sm:$0x1] %vm87_vm14, %v86_v29  }
  0x90   :  { %v92_v30 = vpop.permute.xlu0 %91  }
  0x91   :  { %94 = vst.msk [vmem:[#allocation0] sm:$0x1] %vm93_vm15, %v92_v30  }
  0x98   :  { %v99_v31 = vld [vmem:[#allocation0] sm:$0x1] }
  0x99   :  { %102 = vst [vmem:[%s210_s1] sm:$0x1] %v99_v31 }

// kernel: res_conv_block.1
= control target key start
LH: loop header
LB: loop body
LE: loop exit
PB: predicated region body
PF: predicated region fallthrough
CT: control target
= control target key end

     0   :  { %s1167_s18 = smov 0   ;;  %s1349_s0 = inlined_call_operand.vmem [shape: bf16[2,18,64], index: 0, kind: input, shape index: {}]   ;;  %s1350_s1 = inlined_call_operand.vmem [shape: bf16[192,256], index: 1, kind: input, shape index: {}]   ;;  %s1351_s2 = inlined_call_operand.vmem [shape: f32[1,256], index: 2, kind: input, shape index: {}]   ;;  %s1352_s3 = inlined_call_operand.vmem [shape: bf16[384,128], index: 3, kind: input, shape index: {}]   ;;  %s1353_s4 = inlined_call_operand.vmem [shape: f32[1,128], index: 4, kind: input, shape index: {}]   ;;  %s1354_s5 = inlined_call_operand.vmem [shape: f32[2,16,128], index: 5, kind: output, shape index: {}]  }
   0x1 LB: > { %s936_s19 = sadd.s32 4294967295, %s1132_s18   ;;  %p940_p0 = scmp.ge.s32.totalorder %s1132_s18, 1  ;;  %s1132_s18 = sphi %s1167_s18, %s15_s18  }
   0x2   : > { %p187_p1 = scmp.lt.s32.totalorder %s1132_s18, 3 }
   0x4   : > { %p188_p2 = pnand %p940_p0, %p187_p1 }
   0x5   : > { %p215_p3 = scmp.lt.s32.totalorder (!%p188_p2), %s936_s19, 1 }
   0x6   : > { %191 = sbr.rel (%p188_p2) target bundleno = 477 (0x1dd), region = 40 }
   0xb   : > { %v1064_v0 = vld [vmem:[%s1350_s1 + $0x74] ss:$8 sps:$4 sm:$0xff]   ;;  %v1134_v2 = vmov 0   ;;  %v1068_v3 = vld [vmem:[%s1350_s1 + $0x70] ss:$8 sps:$4 sm:$0xff]   ;;  %s1356_s19 = smov (!%p215_p3, %s936_s19), 1  ;;  %v542_v42 = vlaneseq }
   0xc   : > { %v1066_v1 = vld [vmem:[%s1350_s1 + $0x34] ss:$8 sps:$4 sm:$0xff]   ;;  %342 = vmatprep.mubr.bf16.mxu0 %v1134_v2  ;;  %427 = vmatprep.mubr.bf16.mxu1 %v1134_v2  ;;  %v1069_v4 = vld [vmem:[%s1350_s1 + $0x30] ss:$8 sps:$4 sm:$0xff]   ;;  %v1070_v5 = vld [vmem:[%s1350_s1 + $0x64] ss:$8 sps:$4 sm:$0xff]  }
   0xd   : > { %318 = vmatprep.subr.bf16.mxu0 %v1064_v0  ;;  %403 = vmatprep.subr.bf16.mxu1 %v1066_v1  ;;  %v1072_v6 = vld [vmem:[%s1350_s1 + $0x24] ss:$8 sps:$4 sm:$0xff]   ;;  %v1074_v7 = vld [vmem:[%s1350_s1 + $0x60] ss:$8 sps:$4 sm:$0xff]   ;;  %s1052_s9 = smul.u32 12, %s1356_s19  ;;  %vm306_vm1 = vcmask 523264  }
   0xe   : > { %319 = vmatpush1.bf16.msra.mxu0 %v1068_v3  ;;  %404 = vmatpush1.bf16.msra.mxu1 %v1069_v4  ;;  %v1075_v8 = vld [vmem:[%s1350_s1 + $0x20] ss:$8 sps:$4 sm:$0xff]   ;;  %v1076_v9 = vld [vmem:[%s1350_s1 + $0x54] ss:$8 sps:$4 sm:$0xff]   ;;  %v1080_v11 = vld [vmem:[%s1350_s1 + $0x50] ss:$8 sps:$4 sm:$0xff]  }
   0xf   : > { %320 = vmatprep.subr.bf16.mxu0 %v1070_v5  ;;  %405 = vmatprep.subr.bf16.mxu1 %v1072_v6  ;;  %v1078_v10 = vld [vmem:[%s1350_s1 + $0x14] ss:$8 sps:$4 sm:$0xff]   ;;  %v1081_v12 = vld [vmem:[%s1350_s1 + $0x10] ss:$8 sps:$4 sm:$0xff]   ;;  %v1082_v13 = vld [vmem:[%s1350_s1 + $0x44] ss:$8 sps:$4 sm:$0xff]   ;;  %s219_s26 = scalar_lea.vmem %s1349_s0, %s1052_s9 }
  0x10   : > { %v1084_v14 = vld [vmem:[%s1350_s1 + $0x4] ss:$8 sps:$4 sm:$0xff]   ;;  %v1086_v15 = vld [vmem:[%s1350_s1 + $0x40] ss:$8 sps:$4 sm:$0xff]   ;;  %v1092_v21 = vld [vmem:[%s1350_s1 + $0xb4] ss:$8 sps:$4 sm:$0xff]  }
  0x11   : > { %v1087_v16 = vld [vmem:[%s1350_s1] ss:$8 sps:$4 sm:$0xff]   ;;  %vm253_vm0 = vsmask.f32 7424  ;;  %v1090_v25 = vld [vmem:[%s1350_s1 + $0xb0] ss:$8 sps:$4 sm:$0xff]  }
  0x12   : > { %321 = vmatpush1.bf16.msra.mxu0 %v1074_v7  ;;  %406 = vmatpush1.bf16.msra.mxu1 %v1075_v8  ;;  %v1088_v17 = vld [vmem:[%s219_s26] sm:$0xff]   ;;  %v1089_v18 = vld [vmem:[%s219_s26 + $0x8] ss:$0 sps:$4 sm:$0x11]   ;;  %v1098_v32 = vld [vmem:[%s1350_s1 + $0x94] ss:$8 sps:$4 sm:$0xff]  }
  0x13   : > { %322 = vmatprep.subr.bf16.mxu0 %v1076_v9  ;;  %407 = vmatprep.subr.bf16.mxu1 %v1078_v10  ;;  %v255_v19 = vshrl.u32 %v1088_v17, 16  ;;  %v257_v20 = vshll.u32 %v1088_v17, 16  ;;  %v262_v22 = vshll.u32 %v1089_v18, 16  ;;  %v1095_v27 = vld [vmem:[%s1350_s1 + $0xa4] ss:$8 sps:$4 sm:$0xff]   ;;  %v447_v28 = vrot.slane %v1088_v17, 1 }
  0x14   : > { %v448_v29 = vrot.slane %v1089_v18, 1  ;;  %v1093_v31 = vld [vmem:[%s1350_s1 + $0xa0] ss:$8 sps:$4 sm:$0xff]   ;;  %vm446_vm2 = vcmask 1046528   ;;  %v1096_v33 = vld [vmem:[%s1350_s1 + $0x90] ss:$8 sps:$4 sm:$0xff]  }
  0x15   : > { %v259_v23 = vrot.slane %v257_v20, 1  ;;  %v264_v24 = vrot.slane %v262_v22, 1  ;;  %v1101_v34 = vld [vmem:[%s1350_s1 + $0x84] ss:$8 sps:$4 sm:$0xff]   ;;  %v1099_v35 = vld [vmem:[%s1350_s1 + $0x80] ss:$8 sps:$4 sm:$0xff]  }
  0x16   : > { %323 = vmatpush1.bf16.msra.mxu0 %v1080_v11  ;;  %408 = vmatpush1.bf16.msra.mxu1 %v1081_v12  ;;  %v449_v36 = vsel %vm446_vm2, %v447_v28, %v448_v29  ;;  %v1102_v37 = vld [vmem:[%s1352_s3 + $0xb8] sm:$0xff]   ;;  %v1135_v38 = vmov 0.0   ;;  %v1104_v41 = vld [vmem:[%s1352_s3 + $0xb0] sm:$0xff]   ;;  %v1107_v44 = vld [vmem:[%s1352_s3 + $0xa8] sm:$0xff]   ;;  %v543_v45 = vshrl.u32 %v542_v42, 7  ;;  %vm1136_vm3 = vmmov 0  }
  0x17   : > { %324 = vmatprep.subr.bf16.mxu0 %v1082_v13  ;;  %409 = vmatprep.subr.bf16.mxu1 %v1084_v14  ;;  %v260_v26 = vor.u32 %v259_v23, %v255_v19  ;;  %v1103_v39 = vld [vmem:[%s1352_s3 + $0x78] sm:$0xff]   ;;  %v1106_v43 = vld [vmem:[%s1352_s3 + $0x70] sm:$0xff]   ;;  %v540_v48 = vld [vmem:[%s1351_s2] sm:$0x3]  ;;  %vm568_vm4 = vcmask 1040384   ;;  %s1000_s7 = sshll.u32 %s1356_s19, 4 }
  0x18   : > { %v1105_v40 = vld [vmem:[%s1352_s3 + $0x38] sm:$0xff]   ;;  %v1108_v46 = vld [vmem:[%s1352_s3 + $0x30] sm:$0xff]   ;;  %v548_v47 = vsub.s32 1, %v543_v45  ;;  %v1109_v49 = vld [vmem:[%s1352_s3 + $0x68] sm:$0xff]   ;;  %v544_v9 = vsub.s32 0, %v543_v45  ;;  %s224_s10 = scalar_lea.vmem %s1354_s5, %s1000_s7 }
  0x19   : > { %v265_v30 = vsel %vm253_vm0, %v260_v26, %v264_v24  ;;  %v1110_v50 = vld [vmem:[%s1352_s3 + $0xa0] sm:$0xff]   ;;  %v1111_v52 = vld [vmem:[%s1352_s3 + $0x28] sm:$0xff]   ;;  %v1113_v54 = vld [vmem:[%s1352_s3 + $0x98] sm:$0xff]   ;;  %vm569_vm5 = vsmask.f32 256 }
  0x1a   : > { %325 = vmatpush1.bf16.msra.mxu0 %v1086_v15  ;;  %410 = vmatpush1.bf16.msra.mxu1 %v1087_v16  ;;  %v1288_v51 = vrot.slane %v540_v48, %v548_v47  ;;  %v1112_v53 = vld [vmem:[%s1352_s3 + $0x60] sm:$0xff]   ;;  %v1115_v56 = vld [vmem:[%s1352_s3 + $0x58] sm:$0xff]   ;;  %v1116_v57 = vld [vmem:[%s1352_s3 + $0x90] sm:$0xff]   ;;  %v545_v15 = vrot.slane %v540_v48, %v544_v9 }
  0x1b   : > { %501 = vmatprep.subr.bf16.mxu0 %v1092_v21  ;;  %1001 = vmatprep.subr.bf16.mxu1 %v1103_v39  ;;  %v1114_v55 = vld [vmem:[%s1352_s3 + $0x20] sm:$0xff]   ;;  %v1117_v58 = vld [vmem:[%s1352_s3 + $0x18] sm:$0xff]   ;;  %v1118_v59 = vld [vmem:[%s1352_s3 + $0x50] sm:$0xff]  }
  0x1c   : > { %v1119_v60 = vld [vmem:[%s1352_s3 + $0x88] sm:$0xff]   ;;  %v1120_v61 = vld [vmem:[%s1352_s3 + $0x10] sm:$0xff]   ;;  %v1122_v63 = vld [vmem:[%s1352_s3 + $0x80] sm:$0xff]  }
  0x1d   : > { %963 = vmatmul.mubr.msk.bf16.vlgmr.msra.gmra.mxu1 %vm306_vm1, %v1088_v17  ;;  %954 = vmatmul.mubr.msk.bf16.vlgmr.msra.gmra.mxu0 %vm306_vm1, %v265_v30  ;;  %v1121_v62 = vld [vmem:[%s1352_s3 + $0x48] sm:$0xff]   ;;  %v1124_v1 = vld [vmem:[%s1352_s3 + $0x40] sm:$0xff]   ;;  %vm570_vm6 = vmand %vm568_vm4, %vm569_vm5 }
  0x1e   : > { %502 = vmatpush1.bf16.msra.mxu0 %v1090_v25  ;;  %525 = vmatprep.mubr.bf16.mxu0 %v1134_v2  ;;  %v1123_v0 = vld [vmem:[%s1352_s3 + $0x8] sm:$0xff]   ;;  %v1125_v2 = vld [vmem:[%s1352_s3] sm:$0xff]  }
  0x1f   : > { %503 = vmatprep.subr.bf16.mxu0 %v1095_v27  ;;  %1002 = vmatpush3.bf16.msra.mxu1 %v1105_v40 }
  0x20   : > { %1003 = vmatprep.subr.bf16.mxu1 %v1106_v43 }
  0x22   : > { %504 = vmatpush1.bf16.msra.mxu0 %v1093_v31 }
  0x23   : > { %505 = vmatprep.subr.bf16.mxu0 %v1098_v32  ;;  %1004 = vmatpush3.bf16.msra.mxu1 %v1108_v46 }
  0x24   : > { %1005 = vmatprep.subr.bf16.mxu1 %v1109_v49 }
  0x26   : > { %506 = vmatpush1.bf16.msra.mxu0 %v1096_v33 }
  0x27   : > { %507 = vmatprep.subr.bf16.mxu0 %v1101_v34  ;;  %1006 = vmatpush3.bf16.msra.mxu1 %v1111_v52 }
  0x28   : > { %1007 = vmatprep.subr.bf16.mxu1 %v1112_v53  ;;  %v973_v53 = vld [vmem:[%s1353_s4] ss:$0 sm:$0xff] }
  0x2a   : > { %508 = vmatpush1.bf16.msra.mxu0 %v1099_v35 }
  0x2b   : > { %1032 = vmatprep.subr.bf16.mxu0 %v1135_v38  ;;  %1008 = vmatpush3.bf16.msra.mxu1 %v1114_v55 }
  0x2c   : > { %1009 = vmatprep.subr.bf16.mxu1 %v1115_v56 }
  0x2d   : > { %972 = vmatmul.mubr.msk.bf16.vlgmr.msra.gmra.mxu0 %vm306_vm1, %v449_v36 }
  0x2e   : > { %1033 = vmatpush3.bf16.msra.mxu0 %v1102_v37  ;;  %1048 = vmatprep.mubr.msk.bf16.mxu0 %vm1136_vm3, %v1135_v38 }
  0x2f   : > { %1034 = vmatprep.subr.bf16.mxu0 %v1135_v38  ;;  %1010 = vmatpush3.bf16.msra.mxu1 %v1117_v58 }
  0x30   : > { %1011 = vmatprep.subr.bf16.mxu1 %v1118_v59 }
  0x32   : > { %1035 = vmatpush3.bf16.msra.mxu0 %v1104_v41 }
  0x33   : > { %1036 = vmatprep.subr.bf16.mxu0 %v1135_v38  ;;  %1012 = vmatpush3.bf16.msra.mxu1 %v1120_v61 }
  0x34   : > { %1013 = vmatprep.subr.bf16.mxu1 %v1121_v62 }
  0x36   : > { %1037 = vmatpush3.bf16.msra.mxu0 %v1107_v44 }
  0x37   : > { %1038 = vmatprep.subr.bf16.mxu0 %v1135_v38  ;;  %1014 = vmatpush3.bf16.msra.mxu1 %v1123_v0 }
  0x38   : > { %1015 = vmatprep.subr.bf16.mxu1 %v1124_v1 }
  0x3a   : > { %1039 = vmatpush3.bf16.msra.mxu0 %v1110_v50 }
  0x3b   : > { %1040 = vmatprep.subr.bf16.mxu0 %v1135_v38  ;;  %1016 = vmatpush3.bf16.msra.mxu1 %v1125_v2 }
  0x3e   : > { %1041 = vmatpush3.bf16.msra.mxu0 %v1113_v54 }
  0x3f   : > { %1042 = vmatprep.subr.bf16.mxu0 %v1135_v38 }
  0x42   : > { %1043 = vmatpush3.bf16.msra.mxu0 %v1116_v57 }
  0x43   : > { %1044 = vmatprep.subr.bf16.mxu0 %v1135_v38 }
  0x46   : > { %1045 = vmatpush3.bf16.msra.mxu0 %v1119_v60 }
  0x47   : > { %1046 = vmatprep.subr.bf16.mxu0 %v1135_v38 }
  0x4a   : > { %1047 = vmatpush3.bf16.msra.mxu0 %v1122_v63 }
  0xdd   : > { %v429_v3 = vpop.f32.mrf.mxu1  ;;  %v344_v4 = vpop.f32.mrf.mxu0 }
  0xde   : > { %v430_v12 = vadd.f32 %v429_v3, %v344_v4 }
  0xdf   : > { %v431_v5 = vpop.f32.mrf.mxu1  ;;  %v346_v6 = vpop.f32.mrf.mxu0 }
  0xe0   : > { %v432_v7 = vadd.f32 %v431_v5, %v346_v6 }
  0xe1   : > { %v348_v8 = vpop.f32.mrf.mxu0  ;;  %v433_v10 = vpop.f32.mrf.mxu1 }
  0xe2   : > { %v434_v18 = vadd.f32 %v433_v10, %v348_v8 }
  0xe3   : > { %v350_v11 = vpop.f32.mrf.mxu0  ;;  %v435_v16 = vpop.f32.mrf.mxu1 }
  0xe4   : > { %v436_v21 = vadd.f32 %v435_v16, %v350_v11 }
  0xed   : > { %v527_v13 = vpop.f32.mrf.mxu0 }
  0xee   : > { %v536_v14 = vadd.f32 %v527_v13, %v430_v12 }
  0xef   : > { %v529_v17 = vpop.f32.mrf.mxu0 }
  0xf0   : > { %v537_v19 = vadd.f32 %v529_v17, %v432_v7  ;;  %v552_v22 = vadd.f32 %v545_v15, %v536_v14 }
  0xf1   : > { %v531_v20 = vpop.f32.mrf.mxu0 }
  0xf2   : > { %v553_v23 = vadd.f32 %v1288_v51, %v537_v19  ;;  %v538_v24 = vadd.f32 %v531_v20, %v434_v18  ;;  %v556_v28 = vmax.f32 %v552_v22, 0.0 }
  0xf3   : > { %v533_v25 = vpop.f32.mrf.mxu0 }
  0xf4   : > { %v554_v26 = vadd.f32 %v545_v15, %v538_v24  ;;  %v539_v27 = vadd.f32 %v533_v25, %v436_v21 }
  0xf6   : > { %v557_v29 = vmax.f32 %v554_v26, 0.0  ;;  %v555_v30 = vadd.f32 %v1288_v51, %v539_v27 }
  0xf8   : > { %v558_v31 = vpack.c.bf16 %v557_v29, %v556_v28 }
  0xfa   : > { %v560_v32 = vshrl.u32 %v558_v31, 16  ;;  %v563_v34 = vshll.u32 %v558_v31, 16 }
  0xfc   : > { %v562_v33 = vrot.slane %v560_v32, 7 }
  0xfe   : > { %v565_v35 = vor.u32 %v563_v34, %v562_v33  ;;  %v572_v36 = vsel %vm570_vm6, %v562_v33, 0 }
  0xff   : > { %v589_v39 = vrot.slane %v572_v36, 1  ;;  %v581_v41 = vshll.u32 %v572_v36, 16 }
 0x100   : > { %v571_v37 = vsel %vm570_vm6, 0, %v565_v35 }
 0x101   : > { %v588_v38 = vrot.slane %v571_v37, 1  ;;  %v576_v40 = vshll.u32 %v571_v37, 16  ;;  %v574_v43 = vshrl.u32 %v571_v37, 16  ;;  %v583_v46 = vrot.slane %v581_v41, 1 }
 0x103   : > { %v590_v42 = vsel %vm446_vm2, %v588_v38, %v589_v39  ;;  %v578_v44 = vrot.slane %v576_v40, 1 }
 0x104   : > { %1049 = vmatmul.mubr.bf16.vlgmr.msra.gmra.mxu0 %v590_v42 }
 0x105   : > { %v579_v45 = vor.u32 %v578_v44, %v574_v43 }
 0x107   : > { %v584_v47 = vsel %vm253_vm0, %v579_v45, %v583_v46 }
 0x108   : > { %823 = vmatprep.mubr.bf16.mxu1 %v584_v47 }
 0x109   : > { %824 = vmatmul.mubr.bf16.vlgmr.msra.gmra.mxu1 %v571_v37 }
 0x1c4   : > { %v866_v48 = vpop.f32.mrf.mxu0 }
 0x1c6   : > { %v1050_v49 = vpop.f32.mrf.mxu0 }
 0x1c8   : > { %v869_v50 = vpop.f32.mrf.mxu0 }
 0x1c9   : > { %v1017_v51 = vpop.f32.mrf.mxu1 }
 0x1ca   : > { %v1051_v52 = vpop.f32.mrf.mxu0 }
 0x1cb   : > { %v1018_v54 = vpop.f32.mrf.mxu1 }
 0x1cc   : > { %v1019_v55 = vadd.f32 %v1018_v54, %v1017_v51 }
 0x1cd   : > { %v1020_v56 = vpop.f32.mrf.mxu1 }
 0x1ce   : > { %v826_v57 = vadd.f32 %v1019_v55, %v973_v53 }
 0x1cf   : > { %v1021_v58 = vpop.f32.mrf.mxu1 }
 0x1d0   : > { %v867_v59 = vadd.f32 %v866_v48, %v826_v57  ;;  %v1022_v60 = vadd.f32 %v1021_v58, %v1020_v56 }
 0x1d2   : > { %v873_v61 = vmax.f32 %v867_v59, 0.0  ;;  %v829_v62 = vadd.f32 %v1022_v60, %v973_v53 }
 0x1d4   : > { %v875_v63 = vadd.f32 %v873_v61, %v553_v23  ;;  %v870_v0 = vadd.f32 %v869_v50, %v829_v62 }
 0x1d6   : > { %v877_v1 = vmax.f32 %v875_v63, 0.0  ;;  %v874_v2 = vmax.f32 %v870_v0, 0.0 }
 0x1d8   : > { %879 = vst [vmem:[%s224_s10] sm:$0xff] %v877_v1  ;;  %v876_v3 = vadd.f32 %v874_v2, %v555_v30 }
 0x1da   : > { %v878_v4 = vmax.f32 %v876_v3, 0.0 }
 0x1dc   : > { %880 = vst [vmem:[%s224_s10 + $0x8] sm:$0xff] %v878_v4 }
 0x1dd PF: > { %s15_s18 = sadd.s32 1, %s1132_s18  }
 0x1de   : > { %p12_p4 = scmp.ge.s32.totalorder %s15_s18, 4  }
 0x1e0   :  { %14 = sbr.rel (!%p12_p4) target bundleno = 1 (0x1), region = 70 }

</bundles_post_ra>
